<compile_context>
chip_gen: v5e
topology: v5e:2x2
jax: 0.10.0
libtpu: 0.0.40
codegen_flags: <defaults>
</compile_context>

<pallas_src>
import math
import functools

import jax
import jax.numpy as jnp
from jax.experimental import pallas as pl
from jax.experimental.pallas import tpu as pltpu


# ----------------------------------------------------------------------------
# Kernel
# ----------------------------------------------------------------------------
def _layernorm(x, gamma, beta, eps=1e-6):
    # PyTorch nn.LayerNorm(eps=1e-6): biased variance over the last dim (f32).
    mean = jnp.mean(x, axis=-1, keepdims=True)
    var = jnp.mean((x - mean) ** 2, axis=-1, keepdims=True)
    return (x - mean) * jax.lax.rsqrt(var + eps) * gamma + beta


def encoder_stack_kernel(num_heads,
                         x_ref, mask_ref,
                         wqkv_ref, bqkv_ref, wo_ref, bo_ref,
                         g1_ref, be1_ref,
                         w1_ref, b1_ref, w2_ref, b2_ref,
                         g2_ref, be2_ref,
                         o_ref,
                         carry_ref, attn_ref):
    """Grid = (batch, layer). carry_ref holds the residual stream in VMEM."""
    layer = pl.program_id(1)
    n_layers = pl.num_programs(1)

    # Load the embedded input into the resident carry at the first layer.
    @pl.when(layer == 0)
    def _():
        carry_ref[...] = x_ref[0]

    x = carry_ref[...]                     # (S, D) f32 residual stream
    mask = mask_ref[0]                     # (1, S) — 1.0 where padded
    S, D = x.shape
    H = num_heads
    dk = D // H
    scale = 1.0 / math.sqrt(dk)

    x_bf = x.astype(jnp.bfloat16)

    # --- multi-head attention (fused QKV, heads batched) ----------------------
    qkv = jnp.dot(x_bf, wqkv_ref[0],
                  preferred_element_type=jnp.float32) + bqkv_ref[0]   # (S, 3D)
    q = qkv[:, 0 * D:1 * D]
    k = qkv[:, 1 * D:2 * D]
    v = qkv[:, 2 * D:3 * D]

    # (H, S, dk) head-batched operands (static head split, bf16 MXU operands).
    qh = jnp.stack([q[:, h * dk:(h + 1) * dk] for h in range(H)],
                   axis=0).astype(jnp.bfloat16)
    kh = jnp.stack([k[:, h * dk:(h + 1) * dk] for h in range(H)],
                   axis=0).astype(jnp.bfloat16)
    vh = jnp.stack([v[:, h * dk:(h + 1) * dk] for h in range(H)],
                   axis=0).astype(jnp.bfloat16)

    scores = jnp.einsum('hqd,hkd->hqk', qh, kh,
                        preferred_element_type=jnp.float32) * scale   # (H,S,S)
    scores = scores + mask[None] * (-1e9)       # additive mask, as in reference
    scores = scores - jnp.max(scores, axis=-1, keepdims=True)
    e = jnp.exp(scores)                                               # f32
    p = e * pl.reciprocal(jnp.sum(e, axis=-1, keepdims=True), approx=True)
    ctx = jnp.einsum('hqk,hkd->hqd', p.astype(jnp.bfloat16), vh,
                     preferred_element_type=jnp.float32)              # (H,S,dk)

    # Write each head's context directly into lane slices of a (S, D) scratch.
    for h in range(H):
        attn_ref[:, h * dk:(h + 1) * dk] = ctx[h]

    attn = jnp.dot(attn_ref[...].astype(jnp.bfloat16), wo_ref[0],
                   preferred_element_type=jnp.float32) + bo_ref[0]
    # dropout: identity (eval mode)

    x1 = _layernorm(x + attn, g1_ref[0], be1_ref[0])                  # f32

    # --- position-wise feed-forward -------------------------------------------
    h1 = jnp.dot(x1.astype(jnp.bfloat16), w1_ref[0],
                 preferred_element_type=jnp.float32) + b1_ref[0]
    h1 = jnp.maximum(h1, 0.0)
    ffn = jnp.dot(h1.astype(jnp.bfloat16), w2_ref[0],
                  preferred_element_type=jnp.float32) + b2_ref[0]

    out = _layernorm(x1 + ffn, g2_ref[0], be2_ref[0])                 # f32
    carry_ref[...] = out

    @pl.when(layer == n_layers - 1)
    def _():
        o_ref[0] = out


def encoder_stack(x, src_mask, p, num_heads):
    """All encoder layers in one pallas_call. x: (B,S,D) f32, mask: (B,1,S)."""
    B, S, D = x.shape
    L, _, F = p["w1"].shape

    def lspec(r, c):
        # Per-layer weight/bias slab, indexed by the (arbitrary) layer axis.
        return pl.BlockSpec((1, r, c), lambda b, l: (l, 0, 0))

    in_specs = [
        pl.BlockSpec((1, S, D), lambda b, l: (b, 0, 0)),   # x (embedded input)
        pl.BlockSpec((1, 1, S), lambda b, l: (b, 0, 0)),   # mask
        lspec(D, 3 * D), lspec(1, 3 * D),                  # wqkv, bqkv
        lspec(D, D), lspec(1, D),                          # wo, bo
        lspec(1, D), lspec(1, D),                          # ln1 gamma, beta
        lspec(D, F), lspec(1, F),                          # w1, b1
        lspec(F, D), lspec(1, D),                          # w2, b2
        lspec(1, D), lspec(1, D),                          # ln2 gamma, beta
    ]

    return pl.pallas_call(
        functools.partial(encoder_stack_kernel, num_heads),
        out_shape=jax.ShapeDtypeStruct((B, S, D), jnp.float32),
        grid=(B, L),
        in_specs=in_specs,
        out_specs=pl.BlockSpec((1, S, D), lambda b, l: (b, 0, 0)),
        scratch_shapes=[
            pltpu.VMEM((S, D), jnp.float32),   # residual-stream carry
            pltpu.VMEM((S, D), jnp.float32),   # attention head assembly
        ],
        compiler_params=pltpu.CompilerParams(
            dimension_semantics=("parallel", "arbitrary"),
            vmem_limit_bytes=32 * 1024 * 1024),
    )(x, src_mask,
      p["wqkv"], p["bqkv"], p["wo"], p["bo"],
      p["ln1_g"], p["ln1_b"],
      p["w1"], p["b1"], p["w2"], p["b2"],
      p["ln2_g"], p["ln2_b"])


# ----------------------------------------------------------------------------
# Glue: embedding, positional encoding, parameter init, full forward
# ----------------------------------------------------------------------------
def positional_encoding(max_len, d_model):
    position = jnp.arange(max_len, dtype=jnp.float32)[:, None]
    div_term = jnp.exp(jnp.arange(0, d_model, 2, dtype=jnp.float32)
                       * -(math.log(10000.0) / d_model))
    pe = jnp.zeros((max_len, d_model), jnp.float32)
    pe = pe.at[:, 0::2].set(jnp.sin(position * div_term))
    pe = pe.at[:, 1::2].set(jnp.cos(position * div_term))
    return pe[None]  # (1, max_len, d_model)


def init_params(key, num_layers, src_vocab_size, max_len, d_model, dff):
    L, D, F = num_layers, d_model, dff
    k_emb, k_lay = jax.random.split(key)
    lk = jax.random.split(k_lay, 4)
    s = 1.0 / math.sqrt(D)
    # Matmul weights stored stacked over layers and cast to bf16 (MXU-native);
    # biases and LayerNorm params stay f32.
    params = {
        "embedding": jax.random.normal(k_emb, (src_vocab_size, D),
                                       jnp.float32) * 0.02,
        "pe": positional_encoding(max_len, D),
        "wqkv": (jax.random.normal(lk[0], (L, D, 3 * D), jnp.float32)
                 * s).astype(jnp.bfloat16),
        "bqkv": jnp.zeros((L, 1, 3 * D), jnp.float32),
        "wo": (jax.random.normal(lk[1], (L, D, D), jnp.float32)
               * s).astype(jnp.bfloat16),
        "bo": jnp.zeros((L, 1, D), jnp.float32),
        "ln1_g": jnp.ones((L, 1, D), jnp.float32),
        "ln1_b": jnp.zeros((L, 1, D), jnp.float32),
        "w1": (jax.random.normal(lk[2], (L, D, F), jnp.float32)
               * s).astype(jnp.bfloat16),
        "b1": jnp.zeros((L, 1, F), jnp.float32),
        "w2": (jax.random.normal(lk[3], (L, F, D), jnp.float32)
               * (1.0 / math.sqrt(F))).astype(jnp.bfloat16),
        "b2": jnp.zeros((L, 1, D), jnp.float32),
        "ln2_g": jnp.ones((L, 1, D), jnp.float32),
        "ln2_b": jnp.zeros((L, 1, D), jnp.float32),
    }
    return params


def encoder_forward(tokens, src_mask, params, d_model, num_heads):
    # Embedding gather + scale + positional encoding (glue; dropout = identity).
    x = params["embedding"][tokens] * math.sqrt(d_model)        # (B, S, D) f32
    x = x + params["pe"][:, : tokens.shape[1]]
    return encoder_stack(x, src_mask, params, num_heads)


# ----------------------------------------------------------------------------
if __name__ == "__main__":
    num_layers = 2
    src_vocab_size = 50
    max_len = 16
    d_model = 32
    num_heads = 4
    dff = 64
    B, S = 2, 8

    key = jax.random.PRNGKey(0)
    pkey, tkey = jax.random.split(key)

    params = init_params(pkey, num_layers, src_vocab_size, max_len, d_model, dff)

    tokens = jax.random.randint(tkey, (B, S), 1, src_vocab_size, dtype=jnp.int32)
    tokens = tokens.at[:, -2:].set(0)                 # pad token = 0
    # src_mask: 1.0 where padded (masked out), 0.0 elsewhere — shape (B, 1, S)
    src_mask = (tokens == 0).astype(jnp.float32)[:, None, :]

    out = encoder_forward(tokens, src_mask, params, d_model, num_heads)
    out = jax.block_until_ready(out)
    assert out.shape == (B, S, d_model)
    assert bool(jnp.all(jnp.isfinite(out)))
    print("KERNEL_OK")
</pallas_src>

<mosaic_0001>
module attributes {stable_mosaic.version = 11 : i64} {
  func.func @encoder_stack_kernel(%arg0: i32, %arg1: i32, %arg2: memref<1x8x32xf32, #tpu.memory_space<vmem>>, %arg3: memref<1x1x8xf32, #tpu.memory_space<vmem>>, %arg4: memref<1x32x96xbf16, #tpu.memory_space<vmem>>, %arg5: memref<1x1x96xf32, #tpu.memory_space<vmem>>, %arg6: memref<1x32x32xbf16, #tpu.memory_space<vmem>>, %arg7: memref<1x1x32xf32, #tpu.memory_space<vmem>>, %arg8: memref<1x1x32xf32, #tpu.memory_space<vmem>>, %arg9: memref<1x1x32xf32, #tpu.memory_space<vmem>>, %arg10: memref<1x32x64xbf16, #tpu.memory_space<vmem>>, %arg11: memref<1x1x64xf32, #tpu.memory_space<vmem>>, %arg12: memref<1x64x32xbf16, #tpu.memory_space<vmem>>, %arg13: memref<1x1x32xf32, #tpu.memory_space<vmem>>, %arg14: memref<1x1x32xf32, #tpu.memory_space<vmem>>, %arg15: memref<1x1x32xf32, #tpu.memory_space<vmem>>, %arg16: memref<1x8x32xf32, #tpu.memory_space<vmem>>, %arg17: memref<8x32xf32, #tpu.memory_space<vmem>>, %arg18: memref<8x32xf32, #tpu.memory_space<vmem>>) attributes {dimension_semantics = [#tpu.dimension_semantics<parallel>, #tpu.dimension_semantics<arbitrary>], iteration_bounds = array<i64: 2, 2>, scalar_prefetch = 0 : i64, scratch_operands = 2 : i64, tpu.core_type = #tpu.core_type<tc>, window_params = [{transform_indices = @transform_0, window_bounds = array<i64: 1, 8, 32>}, {transform_indices = @transform_1, window_bounds = array<i64: 1, 1, 8>}, {transform_indices = @transform_2, window_bounds = array<i64: 1, 32, 96>}, {transform_indices = @transform_3, window_bounds = array<i64: 1, 1, 96>}, {transform_indices = @transform_4, window_bounds = array<i64: 1, 32, 32>}, {transform_indices = @transform_5, window_bounds = array<i64: 1, 1, 32>}, {transform_indices = @transform_6, window_bounds = array<i64: 1, 1, 32>}, {transform_indices = @transform_7, window_bounds = array<i64: 1, 1, 32>}, {transform_indices = @transform_8, window_bounds = array<i64: 1, 32, 64>}, {transform_indices = @transform_9, window_bounds = array<i64: 1, 1, 64>}, {transform_indices = @transform_10, window_bounds = array<i64: 1, 64, 32>}, {transform_indices = @transform_11, window_bounds = array<i64: 1, 1, 32>}, {transform_indices = @transform_12, window_bounds = array<i64: 1, 1, 32>}, {transform_indices = @transform_13, window_bounds = array<i64: 1, 1, 32>}, {transform_indices = @transform_14, window_bounds = array<i64: 1, 8, 32>}]} {
    %c0_i32 = arith.constant 0 : i32
    %0 = arith.cmpi eq, %arg1, %c0_i32 : i32
    %1 = arith.extui %0 : i1 to i32
    %c0_i32_0 = arith.constant 0 : i32
    %2 = arith.cmpi ne, %1, %c0_i32_0 : i32
    scf.if %2 {
      %c0_71 = arith.constant 0 : index
      %c0_72 = arith.constant 0 : index
      %c0_73 = arith.constant 0 : index
      %164 = vector.load %arg2[%c0_71, %c0_72, %c0_73] : memref<1x8x32xf32, #tpu.memory_space<vmem>>, vector<1x8x32xf32>
      %165 = vector.shape_cast %164 : vector<1x8x32xf32> to vector<8x32xf32>
      %c0_74 = arith.constant 0 : index
      %c0_75 = arith.constant 0 : index
      %166 = vector.load %arg17[%c0_74, %c0_75] : memref<8x32xf32, #tpu.memory_space<vmem>>, vector<8x32xf32>
      tpu.vector_store %arg17[%c0_74, %c0_75], %165 {strides = array<i32>} : memref<8x32xf32, #tpu.memory_space<vmem>>, vector<8x32xf32>,
    } else {
    }
    %c0 = arith.constant 0 : index
    %c0_1 = arith.constant 0 : index
    %3 = vector.load %arg17[%c0, %c0_1] : memref<8x32xf32, #tpu.memory_space<vmem>>, vector<8x32xf32>
    %c0_2 = arith.constant 0 : index
    %c0_3 = arith.constant 0 : index
    %c0_4 = arith.constant 0 : index
    %4 = vector.load %arg3[%c0_2, %c0_3, %c0_4] : memref<1x1x8xf32, #tpu.memory_space<vmem>>, vector<1x1x8xf32>
    %5 = vector.shape_cast %4 : vector<1x1x8xf32> to vector<1x8xf32>
    %6 = arith.truncf %3 : vector<8x32xf32> to vector<8x32xbf16>
    %c0_5 = arith.constant 0 : index
    %c0_6 = arith.constant 0 : index
    %c0_7 = arith.constant 0 : index
    %7 = vector.load %arg4[%c0_5, %c0_6, %c0_7] : memref<1x32x96xbf16, #tpu.memory_space<vmem>>, vector<1x32x96xbf16>
    %8 = vector.shape_cast %7 : vector<1x32x96xbf16> to vector<32x96xbf16>
    %cst = arith.constant dense<0.000000e+00> : vector<8x96xf32>
    %9 = tpu.matmul %6, %8, %cst {dimension_numbers = #tpu.dot_dimension_numbers<[1], [0], [0], [1], [0, 0, 1, 1], [], []>} : vector<8x32xbf16>, vector<32x96xbf16>, vector<8x96xf32> -> vector<8x96xf32>
    %c0_8 = arith.constant 0 : index
    %c0_9 = arith.constant 0 : index
    %c0_10 = arith.constant 0 : index
    %10 = vector.load %arg5[%c0_8, %c0_9, %c0_10] : memref<1x1x96xf32, #tpu.memory_space<vmem>>, vector<1x1x96xf32>
    %11 = vector.shape_cast %10 : vector<1x1x96xf32> to vector<1x96xf32>
    %12 = vector.broadcast %11 : vector<1x96xf32> to vector<8x96xf32>
    %13 = arith.addf %9, %12 : vector<8x96xf32>
    %14 = vector.extract_strided_slice %13 {offsets = [0, 0], sizes = [8, 32], strides = [1, 1]} : vector<8x96xf32> to vector<8x32xf32>
    %15 = vector.extract_strided_slice %13 {offsets = [0, 32], sizes = [8, 32], strides = [1, 1]} : vector<8x96xf32> to vector<8x32xf32>
    %16 = vector.extract_strided_slice %13 {offsets = [0, 64], sizes = [8, 32], strides = [1, 1]} : vector<8x96xf32> to vector<8x32xf32>
    %17 = vector.extract_strided_slice %14 {offsets = [0, 0], sizes = [8, 8], strides = [1, 1]} : vector<8x32xf32> to vector<8x8xf32>
    %18 = vector.extract_strided_slice %14 {offsets = [0, 8], sizes = [8, 8], strides = [1, 1]} : vector<8x32xf32> to vector<8x8xf32>
    %19 = vector.extract_strided_slice %14 {offsets = [0, 16], sizes = [8, 8], strides = [1, 1]} : vector<8x32xf32> to vector<8x8xf32>
    %20 = vector.extract_strided_slice %14 {offsets = [0, 24], sizes = [8, 8], strides = [1, 1]} : vector<8x32xf32> to vector<8x8xf32>
    %21 = vector.shape_cast %17 : vector<8x8xf32> to vector<1x8x8xf32>
    %22 = vector.shape_cast %18 : vector<8x8xf32> to vector<1x8x8xf32>
    %23 = vector.shape_cast %19 : vector<8x8xf32> to vector<1x8x8xf32>
    %24 = vector.shape_cast %20 : vector<8x8xf32> to vector<1x8x8xf32>
    %25 = tpu.concatenate %21, %22, %23, %24 in 0 : vector<1x8x8xf32>, vector<1x8x8xf32>, vector<1x8x8xf32>, vector<1x8x8xf32> -> vector<4x8x8xf32>
    %26 = arith.truncf %25 : vector<4x8x8xf32> to vector<4x8x8xbf16>
    %27 = vector.extract_strided_slice %15 {offsets = [0, 0], sizes = [8, 8], strides = [1, 1]} : vector<8x32xf32> to vector<8x8xf32>
    %28 = vector.extract_strided_slice %15 {offsets = [0, 8], sizes = [8, 8], strides = [1, 1]} : vector<8x32xf32> to vector<8x8xf32>
    %29 = vector.extract_strided_slice %15 {offsets = [0, 16], sizes = [8, 8], strides = [1, 1]} : vector<8x32xf32> to vector<8x8xf32>
    %30 = vector.extract_strided_slice %15 {offsets = [0, 24], sizes = [8, 8], strides = [1, 1]} : vector<8x32xf32> to vector<8x8xf32>
    %31 = vector.shape_cast %27 : vector<8x8xf32> to vector<1x8x8xf32>
    %32 = vector.shape_cast %28 : vector<8x8xf32> to vector<1x8x8xf32>
    %33 = vector.shape_cast %29 : vector<8x8xf32> to vector<1x8x8xf32>
    %34 = vector.shape_cast %30 : vector<8x8xf32> to vector<1x8x8xf32>
    %35 = tpu.concatenate %31, %32, %33, %34 in 0 : vector<1x8x8xf32>, vector<1x8x8xf32>, vector<1x8x8xf32>, vector<1x8x8xf32> -> vector<4x8x8xf32>
    %36 = arith.truncf %35 : vector<4x8x8xf32> to vector<4x8x8xbf16>
    %37 = vector.extract_strided_slice %16 {offsets = [0, 0], sizes = [8, 8], strides = [1, 1]} : vector<8x32xf32> to vector<8x8xf32>
    %38 = vector.extract_strided_slice %16 {offsets = [0, 8], sizes = [8, 8], strides = [1, 1]} : vector<8x32xf32> to vector<8x8xf32>
    %39 = vector.extract_strided_slice %16 {offsets = [0, 16], sizes = [8, 8], strides = [1, 1]} : vector<8x32xf32> to vector<8x8xf32>
    %40 = vector.extract_strided_slice %16 {offsets = [0, 24], sizes = [8, 8], strides = [1, 1]} : vector<8x32xf32> to vector<8x8xf32>
    %41 = vector.shape_cast %37 : vector<8x8xf32> to vector<1x8x8xf32>
    %42 = vector.shape_cast %38 : vector<8x8xf32> to vector<1x8x8xf32>
    %43 = vector.shape_cast %39 : vector<8x8xf32> to vector<1x8x8xf32>
    %44 = vector.shape_cast %40 : vector<8x8xf32> to vector<1x8x8xf32>
    %45 = tpu.concatenate %41, %42, %43, %44 in 0 : vector<1x8x8xf32>, vector<1x8x8xf32>, vector<1x8x8xf32>, vector<1x8x8xf32> -> vector<4x8x8xf32>
    %46 = arith.truncf %45 : vector<4x8x8xf32> to vector<4x8x8xbf16>
    "tpu.trace_start"() <{level = 10 : i32, message = "hqd,hkd->hqk"}> : () -> ()
    %cst_11 = arith.constant dense<0.000000e+00> : vector<4x8x8xf32>
    %47 = tpu.matmul %26, %36, %cst_11 {dimension_numbers = #tpu.dot_dimension_numbers<[2], [2], [1], [1], [0, 0, 0, 1, 1, 1], [0], [0]>} : vector<4x8x8xbf16>, vector<4x8x8xbf16>, vector<4x8x8xf32> -> vector<4x8x8xf32>
    "tpu.trace_stop"() : () -> ()
    %cst_12 = arith.constant 0.353553385 : f32
    %48 = vector.broadcast %cst_12 : f32 to vector<4x8x8xf32>
    %49 = arith.mulf %47, %48 : vector<4x8x8xf32>
    %50 = vector.shape_cast %5 : vector<1x8xf32> to vector<1x1x8xf32>
    %cst_13 = arith.constant -1.000000e+09 : f32
    %51 = vector.broadcast %cst_13 : f32 to vector<1x1x8xf32>
    %52 = arith.mulf %50, %51 : vector<1x1x8xf32>
    %53 = vector.broadcast %52 : vector<1x1x8xf32> to vector<4x8x8xf32>
    %54 = arith.addf %49, %53 : vector<4x8x8xf32>
    %cst_14 = arith.constant dense<0xFF800000> : vector<4x8xf32>
    %55 = vector.multi_reduction <maximumf>, %54, %cst_14 [2] : vector<4x8x8xf32> to vector<4x8xf32>
    %56 = vector.shape_cast %55 : vector<4x8xf32> to vector<4x8x1xf32>
    %57 = vector.broadcast %56 : vector<4x8x1xf32> to vector<4x8x8xf32>
    %58 = arith.subf %54, %57 : vector<4x8x8xf32>
    %59 = math.exp %58 : vector<4x8x8xf32>
    %cst_15 = arith.constant dense<0.000000e+00> : vector<4x8xf32>
    %60 = vector.multi_reduction <add>, %59, %cst_15 [2] : vector<4x8x8xf32> to vector<4x8xf32>
    %61 = vector.shape_cast %60 : vector<4x8xf32> to vector<4x8x1xf32>
    %62 = tpu.reciprocal %61 {approx = true} : vector<4x8x1xf32> -> vector<4x8x1xf32>
    %63 = vector.broadcast %62 : vector<4x8x1xf32> to vector<4x8x8xf32>
    %64 = arith.mulf %59, %63 : vector<4x8x8xf32>
    %65 = arith.truncf %64 : vector<4x8x8xf32> to vector<4x8x8xbf16>
    "tpu.trace_start"() <{level = 10 : i32, message = "hqk,hkd->hqd"}> : () -> ()
    %cst_16 = arith.constant dense<0.000000e+00> : vector<4x8x8xf32>
    %66 = tpu.matmul %65, %46, %cst_16 {dimension_numbers = #tpu.dot_dimension_numbers<[2], [1], [1], [2], [0, 0, 0, 1, 1, 2], [0], [0]>} : vector<4x8x8xbf16>, vector<4x8x8xbf16>, vector<4x8x8xf32> -> vector<4x8x8xf32>
    "tpu.trace_stop"() : () -> ()
    %67 = vector.extract_strided_slice %66 {offsets = [0, 0, 0], sizes = [1, 8, 8], strides = [1, 1, 1]} : vector<4x8x8xf32> to vector<1x8x8xf32>
    %68 = vector.shape_cast %67 : vector<1x8x8xf32> to vector<8x8xf32>
    %c0_17 = arith.constant 0 : index
    %c0_18 = arith.constant 0 : index
    %69 = vector.load %arg18[%c0_17, %c0_18] : memref<8x32xf32, #tpu.memory_space<vmem>>, vector<8x8xf32>
    tpu.vector_store %arg18[%c0_17, %c0_18], %68 {strides = array<i32>} : memref<8x32xf32, #tpu.memory_space<vmem>>, vector<8x8xf32>,
    %70 = vector.extract_strided_slice %66 {offsets = [1, 0, 0], sizes = [1, 8, 8], strides = [1, 1, 1]} : vector<4x8x8xf32> to vector<1x8x8xf32>
    %71 = vector.shape_cast %70 : vector<1x8x8xf32> to vector<8x8xf32>
    %c0_19 = arith.constant 0 : index
    %c8 = arith.constant 8 : index
    %72 = vector.load %arg18[%c0_19, %c8] : memref<8x32xf32, #tpu.memory_space<vmem>>, vector<8x8xf32>
    tpu.vector_store %arg18[%c0_19, %c8], %71 {strides = array<i32>} : memref<8x32xf32, #tpu.memory_space<vmem>>, vector<8x8xf32>,
    %73 = vector.extract_strided_slice %66 {offsets = [2, 0, 0], sizes = [1, 8, 8], strides = [1, 1, 1]} : vector<4x8x8xf32> to vector<1x8x8xf32>
    %74 = vector.shape_cast %73 : vector<1x8x8xf32> to vector<8x8xf32>
    %c0_20 = arith.constant 0 : index
    %c16 = arith.constant 16 : index
    %75 = vector.load %arg18[%c0_20, %c16] : memref<8x32xf32, #tpu.memory_space<vmem>>, vector<8x8xf32>
    tpu.vector_store %arg18[%c0_20, %c16], %74 {strides = array<i32>} : memref<8x32xf32, #tpu.memory_space<vmem>>, vector<8x8xf32>,
    %76 = vector.extract_strided_slice %66 {offsets = [3, 0, 0], sizes = [1, 8, 8], strides = [1, 1, 1]} : vector<4x8x8xf32> to vector<1x8x8xf32>
    %77 = vector.shape_cast %76 : vector<1x8x8xf32> to vector<8x8xf32>
    %c0_21 = arith.constant 0 : index
    %c24 = arith.constant 24 : index
    %78 = vector.load %arg18[%c0_21, %c24] : memref<8x32xf32, #tpu.memory_space<vmem>>, vector<8x8xf32>
    tpu.vector_store %arg18[%c0_21, %c24], %77 {strides = array<i32>} : memref<8x32xf32, #tpu.memory_space<vmem>>, vector<8x8xf32>,
    %c0_22 = arith.constant 0 : index
    %c0_23 = arith.constant 0 : index
    %79 = vector.load %arg18[%c0_22, %c0_23] : memref<8x32xf32, #tpu.memory_space<vmem>>, vector<8x32xf32>
    %80 = arith.truncf %79 : vector<8x32xf32> to vector<8x32xbf16>
    %c0_24 = arith.constant 0 : index
    %c0_25 = arith.constant 0 : index
    %c0_26 = arith.constant 0 : index
    %81 = vector.load %arg6[%c0_24, %c0_25, %c0_26] : memref<1x32x32xbf16, #tpu.memory_space<vmem>>, vector<1x32x32xbf16>
    %82 = vector.shape_cast %81 : vector<1x32x32xbf16> to vector<32x32xbf16>
    %cst_27 = arith.constant dense<0.000000e+00> : vector<8x32xf32>
    %83 = tpu.matmul %80, %82, %cst_27 {dimension_numbers = #tpu.dot_dimension_numbers<[1], [0], [0], [1], [0, 0, 1, 1], [], []>} : vector<8x32xbf16>, vector<32x32xbf16>, vector<8x32xf32> -> vector<8x32xf32>
    %c0_28 = arith.constant 0 : index
    %c0_29 = arith.constant 0 : index
    %c0_30 = arith.constant 0 : index
    %84 = vector.load %arg7[%c0_28, %c0_29, %c0_30] : memref<1x1x32xf32, #tpu.memory_space<vmem>>, vector<1x1x32xf32>
    %85 = vector.shape_cast %84 : vector<1x1x32xf32> to vector<1x32xf32>
    %86 = vector.broadcast %85 : vector<1x32xf32> to vector<8x32xf32>
    %87 = arith.addf %83, %86 : vector<8x32xf32>
    %88 = arith.addf %3, %87 : vector<8x32xf32>
    %c0_31 = arith.constant 0 : index
    %c0_32 = arith.constant 0 : index
    %c0_33 = arith.constant 0 : index
    %89 = vector.load %arg8[%c0_31, %c0_32, %c0_33] : memref<1x1x32xf32, #tpu.memory_space<vmem>>, vector<1x1x32xf32>
    %90 = vector.shape_cast %89 : vector<1x1x32xf32> to vector<1x32xf32>
    %c0_34 = arith.constant 0 : index
    %c0_35 = arith.constant 0 : index
    %c0_36 = arith.constant 0 : index
    %91 = vector.load %arg9[%c0_34, %c0_35, %c0_36] : memref<1x1x32xf32, #tpu.memory_space<vmem>>, vector<1x1x32xf32>
    %92 = vector.shape_cast %91 : vector<1x1x32xf32> to vector<1x32xf32>
    %cst_37 = arith.constant dense<0.000000e+00> : vector<8xf32>
    %93 = vector.multi_reduction <add>, %88, %cst_37 [1] : vector<8x32xf32> to vector<8xf32>
    %94 = vector.shape_cast %93 : vector<8xf32> to vector<8x1xf32>
    %cst_38 = arith.constant 3.200000e+01 : f32
    %95 = vector.broadcast %cst_38 : f32 to vector<8x1xf32>
    %96 = arith.divf %94, %95 : vector<8x1xf32>
    %97 = vector.broadcast %96 : vector<8x1xf32> to vector<8x32xf32>
    %98 = arith.subf %88, %97 : vector<8x32xf32>
    %99 = arith.mulf %98, %98 : vector<8x32xf32>
    %cst_39 = arith.constant dense<0.000000e+00> : vector<8xf32>
    %100 = vector.multi_reduction <add>, %99, %cst_39 [1] : vector<8x32xf32> to vector<8xf32>
    %101 = vector.shape_cast %100 : vector<8xf32> to vector<8x1xf32>
    %cst_40 = arith.constant 3.200000e+01 : f32
    %102 = vector.broadcast %cst_40 : f32 to vector<8x1xf32>
    %103 = arith.divf %101, %102 : vector<8x1xf32>
    %104 = vector.broadcast %96 : vector<8x1xf32> to vector<8x32xf32>
    %105 = arith.subf %88, %104 : vector<8x32xf32>
    %cst_41 = arith.constant 9.99999997E-7 : f32
    %106 = vector.broadcast %cst_41 : f32 to vector<8x1xf32>
    %107 = arith.addf %103, %106 : vector<8x1xf32>
    %108 = math.rsqrt %107 : vector<8x1xf32>
    %109 = vector.broadcast %108 : vector<8x1xf32> to vector<8x32xf32>
    %110 = arith.mulf %105, %109 : vector<8x32xf32>
    %111 = vector.broadcast %90 : vector<1x32xf32> to vector<8x32xf32>
    %112 = arith.mulf %110, %111 : vector<8x32xf32>
    %113 = vector.broadcast %92 : vector<1x32xf32> to vector<8x32xf32>
    %114 = arith.addf %112, %113 : vector<8x32xf32>
    %115 = arith.truncf %114 : vector<8x32xf32> to vector<8x32xbf16>
    %c0_42 = arith.constant 0 : index
    %c0_43 = arith.constant 0 : index
    %c0_44 = arith.constant 0 : index
    %116 = vector.load %arg10[%c0_42, %c0_43, %c0_44] : memref<1x32x64xbf16, #tpu.memory_space<vmem>>, vector<1x32x64xbf16>
    %117 = vector.shape_cast %116 : vector<1x32x64xbf16> to vector<32x64xbf16>
    %cst_45 = arith.constant dense<0.000000e+00> : vector<8x64xf32>
    %118 = tpu.matmul %115, %117, %cst_45 {dimension_numbers = #tpu.dot_dimension_numbers<[1], [0], [0], [1], [0, 0, 1, 1], [], []>} : vector<8x32xbf16>, vector<32x64xbf16>, vector<8x64xf32> -> vector<8x64xf32>
    %c0_46 = arith.constant 0 : index
    %c0_47 = arith.constant 0 : index
    %c0_48 = arith.constant 0 : index
    %119 = vector.load %arg11[%c0_46, %c0_47, %c0_48] : memref<1x1x64xf32, #tpu.memory_space<vmem>>, vector<1x1x64xf32>
    %120 = vector.shape_cast %119 : vector<1x1x64xf32> to vector<1x64xf32>
    %121 = vector.broadcast %120 : vector<1x64xf32> to vector<8x64xf32>
    %122 = arith.addf %118, %121 : vector<8x64xf32>
    %cst_49 = arith.constant 0.000000e+00 : f32
    %123 = vector.broadcast %cst_49 : f32 to vector<8x64xf32>
    %124 = arith.maximumf %122, %123 : vector<8x64xf32>
    %125 = arith.truncf %124 : vector<8x64xf32> to vector<8x64xbf16>
    %c0_50 = arith.constant 0 : index
    %c0_51 = arith.constant 0 : index
    %c0_52 = arith.constant 0 : index
    %126 = vector.load %arg12[%c0_50, %c0_51, %c0_52] : memref<1x64x32xbf16, #tpu.memory_space<vmem>>, vector<1x64x32xbf16>
    %127 = vector.shape_cast %126 : vector<1x64x32xbf16> to vector<64x32xbf16>
    %cst_53 = arith.constant dense<0.000000e+00> : vector<8x32xf32>
    %128 = tpu.matmul %125, %127, %cst_53 {dimension_numbers = #tpu.dot_dimension_numbers<[1], [0], [0], [1], [0, 0, 1, 1], [], []>} : vector<8x64xbf16>, vector<64x32xbf16>, vector<8x32xf32> -> vector<8x32xf32>
    %c0_54 = arith.constant 0 : index
    %c0_55 = arith.constant 0 : index
    %c0_56 = arith.constant 0 : index
    %129 = vector.load %arg13[%c0_54, %c0_55, %c0_56] : memref<1x1x32xf32, #tpu.memory_space<vmem>>, vector<1x1x32xf32>
    %130 = vector.shape_cast %129 : vector<1x1x32xf32> to vector<1x32xf32>
    %131 = vector.broadcast %130 : vector<1x32xf32> to vector<8x32xf32>
    %132 = arith.addf %128, %131 : vector<8x32xf32>
    %133 = arith.addf %114, %132 : vector<8x32xf32>
    %c0_57 = arith.constant 0 : index
    %c0_58 = arith.constant 0 : index
    %c0_59 = arith.constant 0 : index
    %134 = vector.load %arg14[%c0_57, %c0_58, %c0_59] : memref<1x1x32xf32, #tpu.memory_space<vmem>>, vector<1x1x32xf32>
    %135 = vector.shape_cast %134 : vector<1x1x32xf32> to vector<1x32xf32>
    %c0_60 = arith.constant 0 : index
    %c0_61 = arith.constant 0 : index
    %c0_62 = arith.constant 0 : index
    %136 = vector.load %arg15[%c0_60, %c0_61, %c0_62] : memref<1x1x32xf32, #tpu.memory_space<vmem>>, vector<1x1x32xf32>
    %137 = vector.shape_cast %136 : vector<1x1x32xf32> to vector<1x32xf32>
    %cst_63 = arith.constant dense<0.000000e+00> : vector<8xf32>
    %138 = vector.multi_reduction <add>, %133, %cst_63 [1] : vector<8x32xf32> to vector<8xf32>
    %139 = vector.shape_cast %138 : vector<8xf32> to vector<8x1xf32>
    %cst_64 = arith.constant 3.200000e+01 : f32
    %140 = vector.broadcast %cst_64 : f32 to vector<8x1xf32>
    %141 = arith.divf %139, %140 : vector<8x1xf32>
    %142 = vector.broadcast %141 : vector<8x1xf32> to vector<8x32xf32>
    %143 = arith.subf %133, %142 : vector<8x32xf32>
    %144 = arith.mulf %143, %143 : vector<8x32xf32>
    %cst_65 = arith.constant dense<0.000000e+00> : vector<8xf32>
    %145 = vector.multi_reduction <add>, %144, %cst_65 [1] : vector<8x32xf32> to vector<8xf32>
    %146 = vector.shape_cast %145 : vector<8xf32> to vector<8x1xf32>
    %cst_66 = arith.constant 3.200000e+01 : f32
    %147 = vector.broadcast %cst_66 : f32 to vector<8x1xf32>
    %148 = arith.divf %146, %147 : vector<8x1xf32>
    %149 = vector.broadcast %141 : vector<8x1xf32> to vector<8x32xf32>
    %150 = arith.subf %133, %149 : vector<8x32xf32>
    %cst_67 = arith.constant 9.99999997E-7 : f32
    %151 = vector.broadcast %cst_67 : f32 to vector<8x1xf32>
    %152 = arith.addf %148, %151 : vector<8x1xf32>
    %153 = math.rsqrt %152 : vector<8x1xf32>
    %154 = vector.broadcast %153 : vector<8x1xf32> to vector<8x32xf32>
    %155 = arith.mulf %150, %154 : vector<8x32xf32>
    %156 = vector.broadcast %135 : vector<1x32xf32> to vector<8x32xf32>
    %157 = arith.mulf %155, %156 : vector<8x32xf32>
    %158 = vector.broadcast %137 : vector<1x32xf32> to vector<8x32xf32>
    %159 = arith.addf %157, %158 : vector<8x32xf32>
    %c0_68 = arith.constant 0 : index
    %c0_69 = arith.constant 0 : index
    %160 = vector.load %arg17[%c0_68, %c0_69] : memref<8x32xf32, #tpu.memory_space<vmem>>, vector<8x32xf32>
    tpu.vector_store %arg17[%c0_68, %c0_69], %159 {strides = array<i32>} : memref<8x32xf32, #tpu.memory_space<vmem>>, vector<8x32xf32>,
    %c1_i32 = arith.constant 1 : i32
    %161 = arith.cmpi eq, %arg1, %c1_i32 : i32
    %162 = arith.extui %161 : i1 to i32
    %c0_i32_70 = arith.constant 0 : i32
    %163 = arith.cmpi ne, %162, %c0_i32_70 : i32
    scf.if %163 {
      %c0_71 = arith.constant 0 : index
      %c0_72 = arith.constant 0 : index
      %c0_73 = arith.constant 0 : index
      %164 = vector.load %arg16[%c0_71, %c0_72, %c0_73] : memref<1x8x32xf32, #tpu.memory_space<vmem>>, vector<1x8x32xf32>
      %165 = vector.shape_cast %164 : vector<1x8x32xf32> to vector<8x32xf32>
      %166 = vector.shape_cast %159 : vector<8x32xf32> to vector<1x8x32xf32>
      tpu.vector_store %arg16[%c0_71, %c0_72, %c0_73], %166 {strides = array<i32>} : memref<1x8x32xf32, #tpu.memory_space<vmem>>, vector<1x8x32xf32>,
    } else {
    }
    return
  }
  func.func @transform_0(%arg0: i32, %arg1: i32) -> (i32, i32, i32) {
    %c0_i32 = arith.constant 0 : i32
    %c0_i32_0 = arith.constant 0 : i32
    %c0_i32_1 = arith.constant 0 : i32
    return %arg0, %c0_i32, %c0_i32_0 : i32, i32, i32
  }
  func.func @transform_1(%arg0: i32, %arg1: i32) -> (i32, i32, i32) {
    %c0_i32 = arith.constant 0 : i32
    %c0_i32_0 = arith.constant 0 : i32
    %c0_i32_1 = arith.constant 0 : i32
    return %arg0, %c0_i32, %c0_i32_0 : i32, i32, i32
  }
  func.func @transform_2(%arg0: i32, %arg1: i32) -> (i32, i32, i32) {
    %c0_i32 = arith.constant 0 : i32
    %c0_i32_0 = arith.constant 0 : i32
    %c0_i32_1 = arith.constant 0 : i32
    return %arg1, %c0_i32, %c0_i32_0 : i32, i32, i32
  }
  func.func @transform_3(%arg0: i32, %arg1: i32) -> (i32, i32, i32) {
    %c0_i32 = arith.constant 0 : i32
    %c0_i32_0 = arith.constant 0 : i32
    %c0_i32_1 = arith.constant 0 : i32
    return %arg1, %c0_i32, %c0_i32_0 : i32, i32, i32
  }
  func.func @transform_4(%arg0: i32, %arg1: i32) -> (i32, i32, i32) {
    %c0_i32 = arith.constant 0 : i32
    %c0_i32_0 = arith.constant 0 : i32
    %c0_i32_1 = arith.constant 0 : i32
    return %arg1, %c0_i32, %c0_i32_0 : i32, i32, i32
  }
  func.func @transform_5(%arg0: i32, %arg1: i32) -> (i32, i32, i32) {
    %c0_i32 = arith.constant 0 : i32
    %c0_i32_0 = arith.constant 0 : i32
    %c0_i32_1 = arith.constant 0 : i32
    return %arg1, %c0_i32, %c0_i32_0 : i32, i32, i32
  }
  func.func @transform_6(%arg0: i32, %arg1: i32) -> (i32, i32, i32) {
    %c0_i32 = arith.constant 0 : i32
    %c0_i32_0 = arith.constant 0 : i32
    %c0_i32_1 = arith.constant 0 : i32
    return %arg1, %c0_i32, %c0_i32_0 : i32, i32, i32
  }
  func.func @transform_7(%arg0: i32, %arg1: i32) -> (i32, i32, i32) {
    %c0_i32 = arith.constant 0 : i32
    %c0_i32_0 = arith.constant 0 : i32
    %c0_i32_1 = arith.constant 0 : i32
    return %arg1, %c0_i32, %c0_i32_0 : i32, i32, i32
  }
  func.func @transform_8(%arg0: i32, %arg1: i32) -> (i32, i32, i32) {
    %c0_i32 = arith.constant 0 : i32
    %c0_i32_0 = arith.constant 0 : i32
    %c0_i32_1 = arith.constant 0 : i32
    return %arg1, %c0_i32, %c0_i32_0 : i32, i32, i32
  }
  func.func @transform_9(%arg0: i32, %arg1: i32) -> (i32, i32, i32) {
    %c0_i32 = arith.constant 0 : i32
    %c0_i32_0 = arith.constant 0 : i32
    %c0_i32_1 = arith.constant 0 : i32
    return %arg1, %c0_i32, %c0_i32_0 : i32, i32, i32
  }
  func.func @transform_10(%arg0: i32, %arg1: i32) -> (i32, i32, i32) {
    %c0_i32 = arith.constant 0 : i32
    %c0_i32_0 = arith.constant 0 : i32
    %c0_i32_1 = arith.constant 0 : i32
    return %arg1, %c0_i32, %c0_i32_0 : i32, i32, i32
  }
  func.func @transform_11(%arg0: i32, %arg1: i32) -> (i32, i32, i32) {
    %c0_i32 = arith.constant 0 : i32
    %c0_i32_0 = arith.constant 0 : i32
    %c0_i32_1 = arith.constant 0 : i32
    return %arg1, %c0_i32, %c0_i32_0 : i32, i32, i32
  }
  func.func @transform_12(%arg0: i32, %arg1: i32) -> (i32, i32, i32) {
    %c0_i32 = arith.constant 0 : i32
    %c0_i32_0 = arith.constant 0 : i32
    %c0_i32_1 = arith.constant 0 : i32
    return %arg1, %c0_i32, %c0_i32_0 : i32, i32, i32
  }
  func.func @transform_13(%arg0: i32, %arg1: i32) -> (i32, i32, i32) {
    %c0_i32 = arith.constant 0 : i32
    %c0_i32_0 = arith.constant 0 : i32
    %c0_i32_1 = arith.constant 0 : i32
    return %arg1, %c0_i32, %c0_i32_0 : i32, i32, i32
  }
  func.func @transform_14(%arg0: i32, %arg1: i32) -> (i32, i32, i32) {
    %c0_i32 = arith.constant 0 : i32
    %c0_i32_0 = arith.constant 0 : i32
    %c0_i32_1 = arith.constant 0 : i32
    return %arg0, %c0_i32, %c0_i32_0 : i32, i32, i32
  }
}

</mosaic_0001>

<bundles_post_ra>
// kernel: tpu_custom_call.1
= control target key start
LH: loop header
LB: loop body
LE: loop exit
PB: predicated region body
PF: predicated region fallthrough
CT: control target
= control target key end

     0   :  { %s2616_s0 = inlined_call_operand.hbm [shape: f32[2,8,32], index: 0, kind: input, shape index: {}]   ;;  %s2617_s1 = inlined_call_operand.hbm [shape: f32[2,1,8], index: 1, kind: input, shape index: {}]   ;;  %s2618_s2 = inlined_call_operand.vmem [shape: bf16[2,32,96], index: 2, kind: input, shape index: {}]   ;;  %s2619_s3 = inlined_call_operand.hbm [shape: f32[2,1,96], index: 3, kind: input, shape index: {}]   ;;  %s2620_s4 = inlined_call_operand.vmem [shape: bf16[2,32,32], index: 4, kind: input, shape index: {}]   ;;  %s2621_s5 = inlined_call_operand.vmem [shape: f32[2,1,32], index: 5, kind: input, shape index: {}]   ;;  %s2622_s6 = inlined_call_operand.vmem [shape: f32[2,1,32], index: 6, kind: input, shape index: {}]   ;;  %s2623_s7 = inlined_call_operand.hbm [shape: f32[2,1,32], index: 7, kind: input, shape index: {}]   ;;  %s2624_s8 = inlined_call_operand.vmem [shape: bf16[2,32,64], index: 8, kind: input, shape index: {}]   ;;  %s2625_s9 = inlined_call_operand.vmem [shape: f32[2,1,64], index: 9, kind: input, shape index: {}]   ;;  %s2626_s10 = inlined_call_operand.vmem [shape: bf16[2,64,32], index: 10, kind: input, shape index: {}]   ;;  %s2627_s11 = inlined_call_operand.vmem [shape: f32[2,1,32], index: 11, kind: input, shape index: {}]   ;;  %s2628_s12 = inlined_call_operand.vmem [shape: f32[2,1,32], index: 12, kind: input, shape index: {}]   ;;  %s2629_s13 = inlined_call_operand.hbm [shape: f32[2,1,32], index: 13, kind: input, shape index: {}]   ;;  %s2630_s14 = inlined_call_operand.hbm [shape: f32[2,8,32], index: 14, kind: output, shape index: {}]  }
   0x1   :  { %2648 = sst [smem:[#allocation33_spill]] %s2616_s0 }
   0x2   :  { %2649 = sst [smem:[#allocation34_spill]] %s2617_s1 }
   0x3   :  { %2650 = sst [smem:[#allocation35_spill]] %s2618_s2 }
   0x4   :  { %2651 = sst [smem:[#allocation36_spill]] %s2619_s3 }
   0x5   :  { %2652 = sst [smem:[#allocation37_spill]] %s2620_s4 }
   0x6   :  { %2653 = sst [smem:[#allocation38_spill]] %s2621_s5 }
   0x7   :  { %2654 = sst [smem:[#allocation39_spill]] %s2622_s6 }
   0x8   :  { %2655 = sst [smem:[#allocation40_spill]] %s2623_s7 }
   0x9   :  { %2656 = sst [smem:[#allocation41_spill]] %s2624_s8 }
   0xa   :  { %2657 = sst [smem:[#allocation42_spill]] %s2625_s9 }
   0xb   :  { %2658 = sst [smem:[#allocation43_spill]] %s2626_s10 }
   0xc   :  { %2659 = sst [smem:[#allocation44_spill]] %s2627_s11 }
   0xd   :  { %2660 = sst [smem:[#allocation45_spill]] %s2628_s12 }
   0xe   :  { %2661 = sst [smem:[#allocation46_spill]] %s2629_s13 }
   0xf   :  { %2662 = sst [smem:[#allocation47_spill]] %s2630_s14 }
  0x10   :  { %19 = vsyncpa [#allocation5], 0 }
  0x11   :  { %21 = vsyncpa [#allocation5 + $0x1], 0 }
  0x12   :  { %22 = vsyncpa [#allocation8], 0 }
  0x13   :  { %24 = vsyncpa [#allocation8 + $0x1], 0 }
  0x14   :  { %25 = vsyncpa [#allocation11], 0 }
  0x15   :  { %27 = vsyncpa [#allocation11 + $0x1], 0 }
  0x16   :  { %28 = vsyncpa [#allocation6], 0 }
  0x17   :  { %30 = vsyncpa [#allocation6 + $0x1], 0  ;;  %s2193_s29 = smov 0   ;;  %s2195_s30 = smov 0  }
  0x18   :  { %s2197_s15 = smov 0   ;;  %s2199_s16 = smov 0  }
  0x19   :  { %s2201_s17 = smov 0   ;;  %s2203_s18 = smov 0  }
  0x1a   :  { %s2205_s19 = smov 0   ;;  %s2207_s20 = smov 0  }
  0x1b   :  { %s2209_s21 = smov 0   ;;  %s2211_s22 = smov 0  }
  0x1c   :  { %s2213_s23 = smov 0  }
  0x1d LB: > { %2663 = sst [smem:[#allocation19_spill]] %s2075_s15  ;;  %s2249_s24 = sadd.s32 4294967295, %s2107_s23   ;;  %s2107_s23 = sphi %s2213_s23, %s36_s23   ;;  %s2103_s22 = sphi %s2211_s22, %s2731_s22   ;;  %s2099_s21 = sphi %s2209_s21, %s2730_s21   ;;  %s2095_s20 = sphi %s2207_s20, %s2729_s20   ;;  %s2091_s19 = sphi %s2205_s19, %s2728_s19   ;;  %s2087_s18 = sphi %s2203_s18, %s2727_s18   ;;  %s2083_s17 = sphi %s2201_s17, %s2735_s17   ;;  %s2079_s16 = sphi %s2199_s16, %s2734_s16   ;;  %s2075_s15 = sphi %s2197_s15, %s2725_s15   ;;  %s2071_s30 = sphi %s2195_s30, %s2733_s30   ;;  %s2067_s29 = sphi %s2193_s29, %s2732_s29  }
  0x1e   : > { %2664 = sst [smem:[#allocation20_spill]] %s2079_s16  ;;  %s1574_s25 = sadd.s32 4294967294, %s2107_s23  }
  0x1f   : > { %2665 = sst [smem:[#allocation21_spill]] %s2087_s18  ;;  %p62_p0 = scmp.ne.s32.totalorder %s2087_s18, %s2083_s17 }
  0x20   : > { %2666 = sst [smem:[#allocation22_spill]] %s2091_s19  ;;  %p63_p1 = scmp.eq.s32.totalorder %s2107_s23, 0 }
  0x21   : > { %2667 = sst [smem:[#allocation23_spill]] %s2095_s20  ;;  %p68_p2 = scmp.ne.s32.totalorder %s2083_s17, %s2079_s16 }
  0x22   : > { %2668 = sst [smem:[#allocation24_spill]] %s2099_s21  ;;  %p69_p3 = scmp.eq.s32.totalorder %s2249_s24, 0 }
  0x23   : > { %2669 = sst [smem:[#allocation25_spill]] %s2103_s22  ;;  %p64_p4 = por %p63_p1, %p62_p0 }
  0x24   : > { %p430_p5 = scmp.eq.s32.totalorder %s2249_s24, 3  ;;  %p2265_p6 = por %p69_p3, %p68_p2 }
  0x25   : > { %p436_p7 = scmp.eq.s32.totalorder %s1574_s25, 3  ;;  %p2636_p10 = scmp.lt.s32.totalorder %s2107_s23, 4 }
  0x26   : > { %p2269_p8 = por %p430_p5, %p62_p0  ;;  %s2279_s16 = sand.u32 1, %s2087_s18  }
  0x27   : > { %p2273_p9 = por %p436_p7, %p68_p2  ;;  %p2284_p11 = pnand %p2636_p10, %p64_p4 }
  0x28   : > { %s2671_s26 = scalar_select %p2269_p8, 1, 0 }
  0x29   : > { %s2673_s27 = scalar_select %p2273_p9, 1, 0 }
  0x2a   : > { %2672 = sst [smem:[#allocation26_spill]] %s2671_s26  ;;  %s478_s14 = scalar_lea.vmem [#allocation7], %s2279_s16 }
  0x2b   : > { %2674 = sst [smem:[#allocation27_spill]] %s2673_s27  ;;  %s485_s11 = sshll.u32 %s478_s14, 4  ;;  %s486_s11 = int_to_ptr.vmem [resolvable:$true] %s485_s11 }
  0x2c   : > { %s2676_s1 = sld [smem:[#allocation34_spill]]  ;;  %p1579_p12 = scmp.ge.s32.totalorder %s2107_s23, 1 }
  0x2d   : > { %s2677_s10 = sand.u32 1, %s2107_s23   ;;  %p603_p13 = scmp.lt.s32.totalorder %s2107_s23, 5 }
  0x2e   : > { %s2296_s9 = scalar_lea.sflag [#allocation8], %s2677_s10  ;;  %s45_s26 = sadd.s32 1, %s2099_s21 }
  0x2f   : > { %p2302_p0 = pnand %p1579_p12, %p603_p13  ;;  %s133_s14 = sadd.s32 1, %s2075_s15 }
  0x30   : > { %p46_p2 = scmp.ge.s32.totalorder %s45_s26, 2  ;;  %p140_p4 = scmp.ne.s32.totalorder %s2075_s15, %s2071_s30 }
  0x31   : > { %p146_p5 = scmp.ne.s32.totalorder %s2071_s30, %s2067_s29  ;;  %s2313_s10 = sand.u32 1, %s2075_s15  }
  0x32   : > { %s481_s27 = scalar_lea.hbm %s2676_s1, %s2103_s22  ;;  %s2737_s26 = smov (%p46_p2, %s45_s26), 0 }
  0x33   : > { %s483_s12 = sshll.u32 %s481_s27, 4  ;;  %2679 = sst [smem:[#allocation28_spill]] %s2737_s26  ;;  %s484_s12 = int_to_ptr.hbm [resolvable:$true] %s483_s12 }
  0x34   : > { %1680 = dma.hbm_to_vmem [thread:$0]  (!%p2284_p11), %s484_s12, 16, %s486_s11, %s2296_s9  }
  0x35   : > { %s2680_s11 = sadd.s32 1, %s2103_s22  ;;  %s130_s12 = ssub.s32 %s2099_s21, %s2737_s26 }
  0x36   : > { %s2739_s11 = smov (!%p46_p2, %s2680_s11), %s2103_s22  ;;  %p142_p7 = por %p140_p4, %p63_p1 }
  0x37   : > { %p50_p12 = scmp.ge.s32.totalorder %s2739_s11, 2  ;;  %p131_p13 = scmp.eq.s32.totalorder %s130_s12, 0 }
  0x38   : > { %p2326_p10 = por %p146_p5, %p69_p3  ;;  %p2683_p9 = scmp.lt.s32.totalorder %s2107_s23, 4 }
  0x39   : > { %s2741_s11 = smov (%p50_p12, %s2739_s11), 0  ;;  %s2687_s7 = sld [smem:[#allocation40_spill]] }
  0x3a   : > { %s2681_s27 = scalar_select %p2326_p10, 1, 0 }
  0x3b   : > { %p2332_p8 = pnand %p2683_p9, %p142_p7  ;;  %2685 = sst [smem:[#allocation30_spill]] %s2741_s11 }
  0x3c   : > { %2682 = sst [smem:[#allocation29_spill]] %s2681_s27  ;;  %s52_s26 = ssub.s32 %s2103_s22, %s2741_s11 }
  0x3d   : > { %s2339_s1 = scalar_select %p131_p13, %s2075_s15, %s133_s14  }
  0x3e   : > { %p53_p1 = scmp.eq.s32.totalorder %s52_s26, 0  ;;  %s2688_s4 = sadd.s32 1, %s2087_s18 }
  0x3f   : > { %2686 = sst [smem:[#allocation31_spill]] %s2339_s1  ;;  %s543_s6 = scalar_lea.hbm %s2687_s7, %s2099_s21 }
  0x40   : > { %s2350_s2 = scalar_select %p53_p1, %s2087_s18, %s2688_s4  }
  0x41   : > { %s545_s5 = sshll.u32 %s543_s6, 4  ;;  %s540_s19 = scalar_lea.vmem [#allocation10], %s2313_s10  ;;  %s546_s5 = int_to_ptr.hbm [resolvable:$true] %s545_s5 }
  0x42   : > { %2689 = sst [smem:[#allocation32_spill]] %s2350_s2  ;;  %s547_s27 = sshll.u32 %s540_s19, 4  ;;  %s548_s27 = int_to_ptr.vmem [resolvable:$true] %s547_s27 }
  0x43   : > { %s2690_s14 = sand.u32 1, %s2107_s23   ;;  %s1577_s26 = sshll.u32 %s2279_s16, 3 }
  0x44   : > { %s538_s1 = scalar_lea.sflag [#allocation11], %s2690_s14  ;;  %s1578_s8 = sshll.u32 %s2103_s22, 3 }
  0x45   : > { %1686 = dma.hbm_to_vmem [thread:$0]  (!%p2332_p8), %s546_s5, 16, %s548_s27, %s538_s1  }
  0x46   : > { %s2691_s0 = sld [smem:[#allocation33_spill]]  ;;  %s460_s7 = scalar_lea.vmem [#allocation4], %s1577_s26 }
  0x47   : > { %s468_s11 = sshll.u32 %s460_s7, 4  ;;  %s457_s2 = scalar_lea.sflag [#allocation5], %s2279_s16  ;;  %s469_s11 = int_to_ptr.vmem [resolvable:$true] %s468_s11 }
  0x48   : > { %s2692_s3 = sld [smem:[#allocation36_spill]]  ;;  %s503_s22 = scalar_lea.vmem [#allocation9], %s2313_s10 }
  0x49   : > { %s510_s18 = sshll.u32 %s503_s22, 4  ;;  %s2693_s13 = sld [smem:[#allocation46_spill]]  ;;  %s511_s18 = int_to_ptr.vmem [resolvable:$true] %s510_s18 }
  0x4a   : > { %s591_s12 = scalar_lea.vmem [#allocation12], %s2313_s10 }
  0x4b   : > { %s598_s4 = sshll.u32 %s591_s12, 4  ;;  %s599_s4 = int_to_ptr.vmem [resolvable:$true] %s598_s4 }
  0x4c   : > { %s464_s6 = scalar_lea.hbm %s2691_s0, %s1578_s8 }
  0x4d   : > { %s466_s19 = sshll.u32 %s464_s6, 4  ;;  %s467_s19 = int_to_ptr.hbm [resolvable:$true] %s466_s19 }
  0x4e   : > { %1677 = dma.hbm_to_vmem [thread:$0]  (!%p2284_p11), %s467_s19, 128, %s469_s11, %s457_s2  }
  0x4f   : > { %s506_s14 = scalar_lea.hbm %s2692_s3, %s2099_s21  ;;  %s594_s8 = scalar_lea.hbm %s2693_s13, %s2099_s21 }
  0x50   : > { %s508_s15 = sshll.u32 %s506_s14, 4  ;;  %s596_s16 = sshll.u32 %s594_s8, 4  ;;  %s509_s15 = int_to_ptr.hbm [resolvable:$true] %s508_s15  ;;  %s597_s16 = int_to_ptr.hbm [resolvable:$true] %s596_s16 }
  0x51   : > { %1683 = dma.hbm_to_vmem [thread:$0]  (!%p2332_p8), %s509_s15, 16, %s511_s18, %s2296_s9  }
  0x52   : > { %1689 = dma.hbm_to_vmem [thread:$0]  (!%p2332_p8), %s597_s16, 16, %s599_s4, %s538_s1  }
  0x53   : > { %607 = sbr.rel (%p2302_p0) target bundleno = 2115 (0x843), region = 76  ;;  %s2383_s2 = sand.u32 (!%p2302_p0), 1, %s2083_s17  }
  0x54   : > { %s2646_s9 = sshll.u32 (!%p2302_p0), %s2383_s2, 3  ;;  %s610_s15 = scalar_lea.sflag (!%p2302_p0), [#allocation5], %s2383_s2 }
  0x55   : > { %s2389_s18 = scalar_lea.vmem (!%p2302_p0), [#allocation4], %s2646_s9 }
  0x58   : > { %2046 = dma.done.wait (%p2265_p6), %s610_s15, 128  }
  0x59   : > { %2048 = vsyncadd (%p2265_p6), %s610_s15, 4294967168  ;;  %s619_s1 = sand.u32 1, %s2249_s24  }
  0x5a   : > { %s620_s22 = scalar_lea.sflag [#allocation8], %s619_s1 }
  0x5b   : > { %2050 = dma.done.wait (%p2265_p6), %s620_s22, 16  }
  0x5c   : > { %2052 = vsyncadd (%p2265_p6), %s620_s22, 4294967280  ;;  %s2402_s10 = sand.u32 1, %s2071_s30  }
  0x5d   : > { %2054 = dma.done.wait (%p2326_p10), %s620_s22, 16  }
  0x5e   : > { %2056 = vsyncadd (%p2326_p10), %s620_s22, 4294967280  ;;  %s638_s24 = scalar_lea.sflag [#allocation11], %s619_s1 }
  0x5f   : > { %2058 = dma.done.wait (%p2326_p10), %s638_s24, 32  }
  0x60   : > { %2060 = vsyncadd (%p2326_p10), %s638_s24, 4294967264  ;;  %s2695_s28 = sld [smem:[#allocation22_spill]]  ;;  %s2705_s11 = sshll.u32 %s2383_s2, 3 }
  0x61   : > { %s2697_s12 = sld [smem:[#allocation35_spill]] }
  0x62   : > { %s2698_s1 = sld [smem:[#allocation37_spill]] }
  0x63   : > { %s2700_s0 = sld [smem:[#allocation41_spill]] }
  0x64   : > { %s2701_s14 = sld [smem:[#allocation42_spill]] }
  0x65   : > { %s2702_s13 = sld [smem:[#allocation43_spill]] }
  0x66   : > { %p746_p3 = scmp.lt.s32.totalorder %s2695_s28, 1  ;;  %s2703_s21 = sld [smem:[#allocation44_spill]] }
  0x67   : > { %s2704_s25 = sld [smem:[#allocation45_spill]]  ;;  %p1590_p6 = scmp.ne.s32.totalorder %s2695_s28, 0 }
  0x68   : > { %s2416_s6 = scalar_select %p746_p3, %s2695_s28, 1 }
  0x6a   : > { %s1648_s19 = sshll.u32 %s2416_s6, 4  ;;  %s769_s26 = scalar_lea.vmem %s2701_s14, %s2416_s6 }
  0x6b   : > { %s750_s4 = scalar_lea.vmem %s2697_s12, %s1648_s19  ;;  %s2429_s22 = scalar_lea.vmem %s2698_s1, %s1648_s19 }
  0x6c   : > { %s2438_s3 = scalar_lea.vmem %s2700_s0, %s1648_s19  ;;  %s1651_s7 = sshll.u32 %s2416_s6, 5 }
  0x6d   : > { %s2448_s16 = scalar_lea.vmem %s2702_s13, %s1651_s7  ;;  %s777_s20 = scalar_lea.vmem %s2703_s21, %s2416_s6 }
  0x6e   : > { %s780_s9 = scalar_lea.vmem %s2704_s25, %s2416_s6  ;;  %s649_s0 = scalar_lea.vmem [#allocation12], %s2402_s10 }
  0x6f   : > { %s2461_s19 = scalar_lea.vmem [#allocation13], %s2705_s11  ;;  %785 = sbr.rel (%p1590_p6) target bundleno = 118 (0x76), region = 100 }
  0x74   : > { %v786_v0 = vld [vmem:[%s2389_s18] sm:$0xff]  ;;  %vm787_vm0 = vcmask 261120  }
  0x75   : > { %788 = vst.msk [vmem:[#allocation2] sm:$0xff] %vm787_vm0, %v786_v0 }
  0x76 PF: > { %v1653_v1 = vld [vmem:[%s750_s4 + $0x8] sm:$0xff]  ;;  %v1652_v2 = vld [vmem:[%s750_s4] sm:$0xff]  ;;  %vm812_vm1 = vcmask 261120   ;;  %s2706_s13 = scalar_lea.vmem [#allocation9], %s2402_s10  ;;  %s2109_s21 = smov 104   ;;  %vm848_vm2 = vcmask 64512  }
  0x77   : > { %822 = vmatpush.bf16.msra.mxu0 %v1653_v1  ;;  %v1793_v5 = vld [vmem:[%s2706_s13] ss:$0 sm:$0xff]  ;;  %s2110_s18 = smov 120   ;;  %s2111_s25 = smov 112   ;;  %vm1005_vm3 = vcmask 1043456   ;;  %vm1090_vm4 = vcmask 130112  }
  0x78   : > { %s2112_s28 = smov 96   ;;  %s2707_s4 = scalar_lea.vmem [#allocation7], %s2383_s2  ;;  %vm1096_vm5 = vcmask 195712   ;;  %vm1102_vm6 = vcmask 261312   ;;  %vm1257_vm11 = vcmask 523264  }
  0x79   : > { %v790_v34 = vld [vmem:[%s2707_s4] sm:$0x1]  ;;  %s2113_s5 = smov 64   ;;  %s2114_s27 = smov 16  }
  0x7a   : > { %v944_v35 = vmul.f32 -1e+09, %v790_v34  ;;  %s2115_s14 = smov 8   ;;  %s2116_s7 = smov 24  }
  0x7b   : > { %823 = vmatpush.bf16.msra.mxu0 %v1652_v2  ;;  %s2708_s15 = sld [smem:[#allocation38_spill]]  ;;  %s2712_s11 = scalar_lea.vmem [#allocation10], %s2402_s10 }
  0x7c   : > { %v2465_v3 = vld [vmem:[#allocation2] sm:$0xff]  ;;  %v946_v38 = vperm.slane %v944_v35, 0  ;;  %s2710_s29 = sld [smem:[#allocation39_spill]] }
  0x7d   : > { %v791_v4 = vpack.c.bf16 %v2465_v3, %v2465_v3 }
  0x7f   : > { %1599 = vmatmul.msk.bf16.vlgmr.msra.gmra.mxu0 %vm812_vm1, %v791_v4 }
  0x81   : > { %s2709_s1 = scalar_lea.vmem %s2708_s15, %s2416_s6 }
  0x82   : > { %s2711_s24 = scalar_lea.vmem %s2710_s29, %s2416_s6 }
  0xfc   : > { %v825_v6 = vpop.f32.mrf.mxu0 }
  0xfd   : > { %v826_v7 = vadd.f32 %v1793_v5, %v825_v6 }
  0xff   : > { %836 = vrot.lane.b32.xlu1 %v826_v7, %s2109_s21  ;;  %830 = vrot.lane.b32.xlu0 %v826_v7, %s2110_s18  ;;  %v839_v9 = vpack.c.bf16 %v826_v7, %v826_v7 }
 0x101   : > { %v844_v10 = vunpack.c.l.b16 %v839_v9 }
 0x103   : > { %v2472_v11 = vpack.c.b16 %v844_v10, %v844_v10 }
 0x104   : > { %v827_v8 = vpop.f32.mrf.mxu0 }
 0x107   : > { %833 = vrot.lane.b32.xlu0 %v826_v7, %s2111_s25 }
 0x10f   : > { %846 = vrot.lane.b32.xlu0 %v2472_v11, %s2112_s28 }
 0x171   : > { %v831_v12 = vpop.permute.xlu0 %830  ;;  %v837_v18 = vpop.permute.xlu1 %836 }
 0x172   : > { %v840_v13 = vpack.c.bf16 %v831_v12, %v831_v12  ;;  %v842_v20 = vpack.c.bf16 %v837_v18, %v837_v18 }
 0x174   : > { %v869_v14 = vunpack.c.l.b16 %v840_v13  ;;  %v917_v23 = vunpack.c.l.b16 %v842_v20 }
 0x176   : > { %v2475_v15 = vpack.c.b16 %v869_v14, %v869_v14  ;;  %v2482_v25 = vpack.c.b16 %v917_v23, %v917_v23 }
 0x178   : > { %871 = vrot.lane.b32.xlu1 %v2475_v15, %s2112_s28 }
 0x179   : > { %v834_v16 = vpop.permute.xlu0 %833 }
 0x17a   : > { %v841_v17 = vpack.c.bf16 %v834_v16, %v834_v16 }
 0x17c   : > { %v893_v19 = vunpack.c.l.b16 %v841_v17 }
 0x17e   : > { %v2478_v21 = vpack.c.b16 %v893_v19, %v893_v19 }
 0x180   : > { %895 = vrot.lane.b32.xlu2 %v2478_v21, %s2112_s28 }
 0x181   : > { %v847_v22 = vpop.permute.xlu0 %846 }
 0x182   : > { %v853_v24 = vsel %vm848_vm2, %v847_v22, 0 }
 0x183   : > { %862 = vmatpush.bf16.xpose.msra.mxu1 %v853_v24 }
 0x188   : > { %919 = vrot.lane.b32.xlu2 %v2482_v25, %s2112_s28 }
 0x18a   : > { %1600 = vmatmul.msk.bf16.vlgmr.msra.gmra.mxu1 %vm848_vm2, %v839_v9 }
 0x1da   : > { %v896_v26 = vpop.permute.xlu2 %895 }
 0x1db   : > { %v901_v27 = vsel %vm848_vm2, %v896_v26, 0 }
 0x1dc   : > { %910 = vmatpush.bf16.xpose.msra.mxu3 %v901_v27 }
 0x1e2   : > { %v920_v28 = vpop.permute.xlu2 %919 }
 0x1e3   : > { %1602 = vmatmul.msk.bf16.vlgmr.msra.gmra.mxu3 %vm848_vm2, %v841_v17  ;;  %v925_v29 = vsel %vm848_vm2, %v920_v28, 0 }
 0x1e4   : > { %934 = vmatpush.bf16.xpose.msrb.mxu0 %v925_v29 }
 0x1ea   : > { %v872_v30 = vpop.permute.xlu1 %871 }
 0x1eb   : > { %1603 = vmatmul.msk.bf16.vlgmr.msrb.gmra.mxu0 %vm848_vm2, %v842_v20  ;;  %v877_v31 = vsel %vm848_vm2, %v872_v30, 0 }
 0x1ec   : > { %886 = vmatpush.bf16.xpose.msra.mxu2 %v877_v31 }
 0x1f3   : > { %1601 = vmatmul.msk.bf16.vlgmr.msra.gmra.mxu2 %vm848_vm2, %v840_v13 }
 0x207   : > { %v864_v32 = vpop.f32.mrf.mxu1 }
 0x208   : > { %v940_v42 = vmul.f32 0.35355338, %v864_v32 }
 0x20a   : > { %v948_v47 = vadd.f32 %v946_v38, %v940_v42 }
 0x20c   : > { %v952_v49 = vsel %vm848_vm2, %v948_v47, -inf }
 0x20f   : > { %v866_v33 = vpop.f32.mrf.mxu1 }
 0x266   : > { %v912_v36 = vpop.f32.mrf.mxu3 }
 0x267   : > { %v942_v37 = vmul.f32 0.35355338, %v912_v36 }
 0x268   : > { %v936_v39 = vpop.f32.mrf.mxu0 }
 0x269   : > { %v943_v40 = vmul.f32 0.35355338, %v936_v39  ;;  %v950_v41 = vadd.f32 %v946_v38, %v942_v37 }
 0x26b   : > { %v958_v43 = vsel %vm848_vm2, %v950_v41, -inf  ;;  %v951_v44 = vadd.f32 %v946_v38, %v943_v40 }
 0x26c   : > { %959 = vmax.xlane.f32.xlu2 %v958_v43 }
 0x26d   : > { %v961_v45 = vsel %vm848_vm2, %v951_v44, -inf }
 0x26e   : > { %v914_v46 = vpop.f32.mrf.mxu3  ;;  %962 = vmax.xlane.f32.xlu0 %v961_v45  ;;  %v1654_v45 = vld [vmem:[%s2429_s22] sm:$0xff] }
 0x270   : > { %v938_v48 = vpop.f32.mrf.mxu0 }
 0x274   : > { %953 = vmax.xlane.f32.xlu2 %v952_v49 }
 0x276   : > { %v888_v50 = vpop.f32.mrf.mxu2 }
 0x277   : > { %v941_v51 = vmul.f32 0.35355338, %v888_v50 }
 0x279   : > { %v949_v52 = vadd.f32 %v946_v38, %v941_v51  ;;  %v1794_v51 = vld [vmem:[%s2709_s1] ss:$0 sm:$0xff] }
 0x27b   : > { %v955_v53 = vsel %vm848_vm2, %v949_v52, -inf }
 0x27c   : > { %956 = vmax.xlane.f32.xlu1 %v955_v53 }
 0x27e   : > { %v890_v54 = vpop.f32.mrf.mxu2 }
 0x2df   : > { %v960_v55 = vpop.xlane.xlu2 %959 }
 0x2e0   : > { %v966_v56 = vsub.f32 %v950_v41, %v960_v55 }
 0x2e1   : > { %v963_v57 = vpop.xlane.xlu0 %962 }
 0x2e2   : > { %v972_v58 = vmul.f32 1.442695, %v966_v56  ;;  %v967_v59 = vsub.f32 %v951_v44, %v963_v57  ;;  %v1655_v44 = vld [vmem:[%s2429_s22 + $0x8] sm:$0xff]  ;;  %v2117_v57 = vmov 32.0  }
 0x2e4   : > { %1801 = vpow2.f32 %v972_v58  ;;  %v974_v60 = vmul.f32 1.442695, %v967_v59 }
 0x2e6   : > { %1803 = vpow2.f32 %v974_v60 }
 0x2e7   : > { %v954_v7 = vpop.xlane.xlu2 %953 }
 0x2e8   : > { %v964_v8 = vsub.f32 %v948_v47, %v954_v7  ;;  %v1661_v7 = vld [vmem:[%s2448_s16 + $0x18] sm:$0xff] }
 0x2ea   : > { %v1802_v61 = vpop.eup %1801  ;;  %v968_v9 = vmul.f32 1.442695, %v964_v8 }
 0x2eb   : > { %v982_v62 = vsel %vm848_vm2, %v1802_v61, 0.0 }
 0x2ec   : > { %v1804_v63 = vpop.eup %1803  ;;  %983 = vadd.xlane.f32.xlu2 %v982_v62 }
 0x2ed   : > { %v985_v0 = vsel %vm848_vm2, %v1804_v63, 0.0 }
 0x2ee   : > { %986 = vadd.xlane.f32.xlu0 %v985_v0 }
 0x2ef   : > { %v957_v1 = vpop.xlane.xlu1 %956 }
 0x2f0   : > { %v965_v2 = vsub.f32 %v949_v52, %v957_v1 }
 0x2f2   : > { %v970_v4 = vmul.f32 1.442695, %v965_v2 }
 0x2f4   : > { %1805 = vpow2.f32 %v970_v4 }
 0x2f5   : > { %1807 = vpow2.f32 %v968_v9 }
 0x2fa   : > { %v1806_v5 = vpop.eup %1805 }
 0x2fb   : > { %v979_v6 = vsel %vm848_vm2, %v1806_v5, 0.0  ;;  %v1808_v10 = vpop.eup %1807 }
 0x2fc   : > { %980 = vadd.xlane.f32.xlu1 %v979_v6  ;;  %v976_v12 = vsel %vm848_vm2, %v1808_v10, 0.0  ;;  %v1656_v6 = vld [vmem:[%s2438_s3] sm:$0xff] }
 0x302   : > { %1064 = vrot.lane.b32.xlu0 %v2482_v25, %s2113_s5 }
 0x304   : > { %1043 = vrot.lane.b32.xlu2 %v2478_v21, %s2113_s5 }
 0x30a   : > { %1000 = vrot.lane.b32.xlu0 %v2472_v11, %s2113_s5 }
 0x315   : > { %1022 = vrot.lane.b32.xlu1 %v2475_v15, %s2113_s5  ;;  %s2716_s5 = sld [smem:[#allocation22_spill]] }
 0x31b   : > { %p1643_p8 = scmp.ne.s32.totalorder %s2716_s5, 1 }
 0x33f   : > { %977 = vadd.xlane.f32.xlu1 %v976_v12 }
 0x35f   : > { %v984_v13 = vpop.xlane.xlu2 %983 }
 0x360   : > { %1809 = vrcp.f32 %v984_v13 }
 0x361   : > { %v987_v17 = vpop.xlane.xlu0 %986 }
 0x362   : > { %1811 = vrcp.f32 %v987_v17 }
 0x366   : > { %v1810_v14 = vpop.eup %1809 }
 0x367   : > { %v994_v16 = vmul.f32 %v1810_v14, %v1802_v61  ;;  %v1044_v18 = vpop.permute.xlu2 %1043 }
 0x368   : > { %v1049_v19 = vsel %vm1005_vm3, %v1044_v18, 0  ;;  %v1812_v15 = vpop.eup %1811 }
 0x369   : > { %1058 = vmatpush.bf16.msrb.mxu3 %v1049_v19  ;;  %v998_v11 = vpack.c.bf16 %v994_v16, %v994_v16  ;;  %v995_v20 = vmul.f32 %v1812_v15, %v1804_v63 }
 0x36b   : > { %v999_v23 = vpack.c.bf16 %v995_v20, %v995_v20  ;;  %v1796_v20 = vld [vmem:[%s2712_s11] ss:$0 sm:$0xff] }
 0x36c   : > { %1606 = vmatmul.msk.bf16.vlgmr.msrb.gmra.mxu3 %vm848_vm2, %v998_v11  ;;  %v1795_v11 = vld [vmem:[%s2711_s24] ss:$0 sm:$0xff] }
 0x36d   : > { %1265 = vmatpush.bf16.msra.mxu3 %v1661_v7 }
 0x36f   : > { %v981_v24 = vpop.xlane.xlu1 %980 }
 0x370   : > { %1813 = vrcp.f32 %v981_v24 }
 0x374   : > { %v1065_v21 = vpop.permute.xlu0 %1064 }
 0x375   : > { %v1070_v22 = vsel %vm1005_vm3, %v1065_v21, 0 }
 0x376   : > { %1079 = vmatpush.bf16.msra.mxu0 %v1070_v22  ;;  %v1814_v27 = vpop.eup %1813 }
 0x377   : > { %v993_v28 = vmul.f32 %v1814_v27, %v1806_v5  ;;  %v1657_v5 = vld [vmem:[%s2438_s3 + $0x8] sm:$0xff]  ;;  %v1797_v27 = vld [vmem:[%s769_s26] ss:$0 sm:$0xff] }
 0x379   : > { %1607 = vmatmul.msk.bf16.vlgmr.msra.gmra.mxu0 %vm848_vm2, %v999_v23  ;;  %v997_v31 = vpack.c.bf16 %v993_v28, %v993_v28 }
 0x37c   : > { %v1001_v25 = vpop.permute.xlu0 %1000 }
 0x37d   : > { %v1007_v26 = vsel %vm1005_vm3, %v1001_v25, 0  ;;  %v1659_v25 = vld [vmem:[%s2448_s16 + $0x8] sm:$0xff] }
 0x37e   : > { %1016 = vmatpush.bf16.msrb.mxu1 %v1007_v26  ;;  %v1658_v26 = vld [vmem:[%s2448_s16] sm:$0xff] }
 0x382   : > { %1135 = vmatpush.bf16.msra.mxu1 %v1655_v44 }
 0x386   : > { %1136 = vmatpush.bf16.msra.mxu1 %v1654_v45 }
 0x387   : > { %v1023_v29 = vpop.permute.xlu1 %1022 }
 0x388   : > { %v1028_v30 = vsel %vm1005_vm3, %v1023_v29, 0 }
 0x389   : > { %1037 = vmatpush.bf16.msrb.mxu2 %v1028_v30 }
 0x38c   : > { %1605 = vmatmul.msk.bf16.vlgmr.msrb.gmra.mxu2 %vm848_vm2, %v997_v31 }
 0x38d   : > { %1212 = vmatpush.bf16.msra.mxu2 %v1657_v5 }
 0x391   : > { %1213 = vmatpush.bf16.msra.mxu2 %v1656_v6 }
 0x3b2   : > { %v978_v32 = vpop.xlane.xlu1 %977 }
 0x3b3   : > { %1815 = vrcp.f32 %v978_v32 }
 0x3b4   : > { %1817 = vrcp.f32 %v2117_v57 }
 0x3b9   : > { %v1816_v33 = vpop.eup %1815 }
 0x3ba   : > { %v992_v34 = vmul.f32 %v1816_v33, %v1808_v10  ;;  %v1818_v58 = vpop.eup %1817  ;;  %v1660_v10 = vld [vmem:[%s2448_s16 + $0x10] sm:$0xff]  ;;  %v1798_v33 = vld [vmem:[%s777_s20] ss:$0 sm:$0xff] }
 0x3bb   : > { %v1149_v59 = vmul.f32 32.0, %v1818_v58  ;;  %vm1153_vm7 = vweird.f32 %v1818_v58  ;;  %1266 = vmatpush.bf16.msra.mxu3 %v1660_v10 }
 0x3bc   : > { %v996_v35 = vpack.c.bf16 %v992_v34, %v992_v34 }
 0x3bd   : > { %v1150_v60 = vsub.f32 1.0, %v1149_v59 }
 0x3be   : > { %1604 = vmatmul.msk.bf16.vlgmr.msrb.gmra.mxu1 %vm848_vm2, %v996_v35 }
 0x3bf   : > { %v1151_v61 = vmul.f32 %v1818_v58, %v1150_v60  ;;  %1267 = vmatpush.bf16.msra.mxu3 %v1659_v25 }
 0x3c1   : > { %v1152_v62 = vadd.f32 %v1818_v58, %v1151_v61 }
 0x3c3   : > { %v1154_v63 = vsel %vm1153_vm7, %v1818_v58, %v1152_v62  ;;  %1268 = vmatpush.bf16.msra.mxu3 %v1658_v26 }
 0x3ef   : > { %v1060_v36 = vpop.f32.mrf.mxu3 }
 0x3f0   : > { %1093 = vrot.lane.b32.xlu0 %v1060_v36, %s2114_s27 }
 0x3f6   : > { %v1081_v37 = vpop.f32.mrf.mxu0 }
 0x3f7   : > { %v1062_v38 = vpop.f32.mrf.mxu3 }
 0x3fe   : > { %v1083_v39 = vpop.f32.mrf.mxu0 }
 0x40f   : > { %v1039_v40 = vpop.f32.mrf.mxu2 }
 0x410   : > { %1087 = vrot.lane.b32.xlu2 %v1039_v40, %s2115_s14 }
 0x417   : > { %v1041_v41 = vpop.f32.mrf.mxu2 }
 0x418   : > { %1099 = vrot.lane.b32.xlu2 %v1081_v37, %s2116_s7 }
 0x43b   : > { %v1018_v42 = vpop.f32.mrf.mxu1 }
 0x43c   : > { %1085 = vst.msk [vmem:[#allocation3] sm:$0xff] %vm848_vm2, %v1018_v42 }
 0x443   : > { %v1020_v43 = vpop.f32.mrf.mxu1 }
 0x462   : > { %v1094_v47 = vpop.permute.xlu0 %1093 }
 0x46a   : > { %v1088_v46 = vpop.permute.xlu2 %1087 }
 0x46b   : > { %1091 = vst.msk [vmem:[#allocation3] sm:$0xff] %vm1090_vm4, %v1088_v46 }
 0x46c   : > { %1097 = vst.msk [vmem:[#allocation3] sm:$0xff] %vm1096_vm5, %v1094_v47 }
 0x472   : > { %v1100_v48 = vpop.permute.xlu2 %1099 }
 0x473   : > { %1103 = vst.msk [vmem:[#allocation3] sm:$0xff] %vm1102_vm6, %v1100_v48 }
 0x47a   : > { %v1104_v49 = vld [vmem:[#allocation3] sm:$0xff] }
 0x47b   : > { %v1105_v50 = vpack.c.bf16 %v1104_v49, %v1104_v49 }
 0x47d   : > { %1616 = vmatmul.msk.bf16.vlgmr.msra.gmra.mxu1 %vm812_vm1, %v1105_v50 }
 0x4fa   : > { %v1138_v52 = vpop.f32.mrf.mxu1 }
 0x4fb   : > { %v1139_v53 = vadd.f32 %v1794_v51, %v1138_v52 }
 0x4fd   : > { %v1142_v54 = vadd.f32 %v1139_v53, %v2465_v3  ;;  %v1799_v53 = vld [vmem:[%s780_s9] ss:$0 sm:$0xff] }
 0x4ff   : > { %v1145_v55 = vsel %vm812_vm1, %v1142_v54, 0.0 }
 0x500   : > { %1146 = vadd.xlane.f32.xlu0 %v1145_v55  ;;  %v1800_v55 = vld [vmem:[%s649_s0] ss:$0 sm:$0xff] }
 0x502   : > { %v1140_v56 = vpop.f32.mrf.mxu1 }
 0x573   : > { %v1147_v0 = vpop.xlane.xlu0 %1146 }
 0x574   : > { %v1155_v1 = vmul.f32 %v1154_v63, %v1147_v0 }
 0x576   : > { %v1156_v3 = vsub.f32 %v1142_v54, %v1155_v1 }
 0x578   : > { %v1157_v2 = vmul.f32 %v1156_v3, %v1156_v3 }
 0x57a   : > { %v1158_v4 = vsel %vm812_vm1, %v1157_v2, 0.0 }
 0x57b   : > { %1159 = vadd.xlane.f32.xlu2 %v1158_v4 }
 0x5ee   : > { %v1160_v8 = vpop.xlane.xlu2 %1159 }
 0x5ef   : > { %v1161_v9 = vmul.f32 %v1160_v8, %v1154_v63 }
 0x5f1   : > { %v1162_v12 = vadd.f32 1e-06, %v1161_v9 }
 0x5f3   : > { %1819 = vrsqrt.f32 %v1162_v12  ;;  %vm1169_vm9 = vweird.f32 %v1162_v12 }
 0x5f9   : > { %v1820_v13 = vpop.eup %1819 }
 0x5fa   : > { %v1164_v14 = vmul.f32 %v1820_v13, %v1162_v12  ;;  %vm1170_vm8 = vweird.f32 %v1820_v13 }
 0x5fb   : > { %vm1171_vm10 = vmor %vm1169_vm9, %vm1170_vm8 }
 0x5fc   : > { %v1165_v16 = vmul.f32 %v1820_v13, %v1164_v14 }
 0x5fe   : > { %v1166_v17 = vmul.f32 0.5, %v1165_v16 }
 0x600   : > { %v1167_v18 = vsub.f32 1.5, %v1166_v17 }
 0x602   : > { %v1168_v19 = vmul.f32 %v1820_v13, %v1167_v18 }
 0x604   : > { %v1172_v15 = vsel %vm1171_vm10, %v1820_v13, %v1168_v19 }
 0x605   : > { %v1173_v21 = vmul.f32 %v1172_v15, %v1156_v3 }
 0x607   : > { %v1177_v22 = vmul.f32 %v1795_v11, %v1173_v21 }
 0x609   : > { %v1181_v23 = vadd.f32 %v1796_v20, %v1177_v22 }
 0x60b   : > { %v1182_v24 = vpack.c.bf16 %v1181_v23, %v1181_v23 }
 0x60d   : > { %1625 = vmatmul.msk.bf16.vlgmr.msra.gmra.mxu2 %vm812_vm1, %v1182_v24 }
 0x690   : > { %v1215_v28 = vpop.f32.mrf.mxu2 }
 0x691   : > { %v1216_v29 = vadd.f32 %v1797_v27, %v1215_v28 }
 0x693   : > { %v1219_v30 = vmax.f32 %v1216_v29, 0.0 }
 0x695   : > { %v1220_v31 = vpack.c.bf16 %v1219_v30, %v1219_v30 }
 0x697   : > { %1642 = vmatmul.msk.bf16.vlgmr.msra.gmra.mxu3 %vm1257_vm11, %v1220_v31 }
 0x698   : > { %v1217_v32 = vpop.f32.mrf.mxu2 }
 0x71a   : > { %v1270_v34 = vpop.f32.mrf.mxu3 }
 0x71b   : > { %v1271_v35 = vadd.f32 %v1798_v33, %v1270_v34 }
 0x71d   : > { %v1274_v36 = vadd.f32 %v1271_v35, %v1181_v23 }
 0x71f   : > { %v1277_v37 = vsel %vm812_vm1, %v1274_v36, 0.0 }
 0x720   : > { %1278 = vadd.xlane.f32.xlu1 %v1277_v37 }
 0x722   : > { %v1272_v38 = vpop.f32.mrf.mxu3 }
 0x793   : > { %v1279_v39 = vpop.xlane.xlu1 %1278 }
 0x794   : > { %v1280_v40 = vmul.f32 %v1279_v39, %v1154_v63 }
 0x796   : > { %v1281_v41 = vsub.f32 %v1274_v36, %v1280_v40 }
 0x798   : > { %v1282_v42 = vmul.f32 %v1281_v41, %v1281_v41 }
 0x79a   : > { %v1283_v43 = vsel %vm812_vm1, %v1282_v42, 0.0 }
 0x79b   : > { %1284 = vadd.xlane.f32.xlu1 %v1283_v43 }
 0x80e   : > { %v1285_v44 = vpop.xlane.xlu1 %1284 }
 0x80f   : > { %v1286_v45 = vmul.f32 %v1285_v44, %v1154_v63 }
 0x811   : > { %v1287_v46 = vadd.f32 1e-06, %v1286_v45 }
 0x813   : > { %1821 = vrsqrt.f32 %v1287_v46  ;;  %vm1294_vm13 = vweird.f32 %v1287_v46 }
 0x819   : > { %v1822_v47 = vpop.eup %1821 }
 0x81a   : > { %v1289_v48 = vmul.f32 %v1822_v47, %v1287_v46  ;;  %vm1295_vm12 = vweird.f32 %v1822_v47 }
 0x81b   : > { %vm1296_vm14 = vmor %vm1294_vm13, %vm1295_vm12 }
 0x81c   : > { %v1290_v49 = vmul.f32 %v1822_v47, %v1289_v48 }
 0x81e   : > { %v1291_v50 = vmul.f32 0.5, %v1290_v49 }
 0x820   : > { %v1292_v51 = vsub.f32 1.5, %v1291_v50 }
 0x822   : > { %v1293_v52 = vmul.f32 %v1822_v47, %v1292_v51 }
 0x824   : > { %v1297_v54 = vsel %vm1296_vm14, %v1822_v47, %v1293_v52 }
 0x825   : > { %v1298_v56 = vmul.f32 %v1297_v54, %v1281_v41 }
 0x827   : > { %v1302_v57 = vmul.f32 %v1799_v53, %v1298_v56  ;;  %1311 = sbr.rel (%p1643_p8) target bundleno = 2093 (0x82d), region = 104 }
 0x829   : > { %v1306_v58 = vadd.f32 %v1800_v55, %v1302_v57 }
 0x82b   : > { %1307 = vst.msk [vmem:[#allocation2] sm:$0xff] %vm812_vm1, %v1306_v58 }
 0x82c   : > { %1312 = vst.msk [vmem:[%s2461_s19] sm:$0xff] %vm812_vm1, %v1306_v58 }
 0x82d PF: > { %s2717_s27 = sld [smem:[#allocation23_spill]]  ;;  %s1326_s8 = sshll.u32 %s2461_s19, 4  ;;  %s1327_s8 = int_to_ptr.vmem [resolvable:$true] %s1326_s8 }
 0x82e   : > { %s2718_s6 = sld [smem:[#allocation26_spill]]  ;;  %s1314_s15 = scalar_lea.sflag [#allocation6], %s2383_s2 }
 0x82f   : > { %s2719_s0 = sld [smem:[#allocation47_spill]] }
 0x833   : > { %s1645_s9 = sshll.u32 %s2717_s27, 3 }
 0x834   : > { %p2720_p10 = scmp.ne.s32.totalorder %s2718_s6, 0 }
 0x835   : > { %s1324_s7 = scalar_lea.hbm %s2719_s0, %s1645_s9  ;;  %s1993_s24 = scalar_lea.hbm %s2719_s0, 16 }
 0x836   : > { %s1328_s12 = sshll.u32 %s1324_s7, 4  ;;  %s1329_s12 = int_to_ptr.hbm [resolvable:$true] %s1328_s12 }
 0x837   : > { %s1987_s1 = sshra.s32 %s1329_s12, 4  ;;  %s1988_s1 = int_to_ptr.hbm [resolvable:$true] %s1987_s1 }
 0x838   : > { %s1989_s3 = scalar_lea.hbm %s1988_s1, 8  ;;  %p1994_p2 = scmp.lt.s32.totalorder %s1988_s1, %s2719_s0 }
 0x839   : > { %p1990_p9 = scmp.ne.s32.totalorder %s1988_s1, %s1989_s3  ;;  %p1995_p4 = scmp.lt.s32.totalorder %s1993_s24, %s1989_s3 }
 0x83b   : > { %p1991_p11 = pnand %p1990_p9, %p2720_p10  ;;  %p1996_p5 = por %p1995_p4, %p1994_p2 }
 0x83d   : > { %p1992_p0 = pneg %p1991_p11 }
 0x83f   : > { %p1997_p7 = pnand %p1996_p5, %p1992_p0 }
 0x841   : > { %2000 = shalt.err (!%p1997_p7)
}
 0x842   : > { %1672 = dma.vmem_to_hbm [thread:$0]  (%p2720_p10), %s1327_s8, 128, %s1329_s12, %s1314_s15  }
 0x843 PF: > { %s2721_s2 = sld [smem:[#allocation20_spill]]  ;;  %p1695_p12 = scmp.ge.s32.totalorder %s2107_s23, 2 }
 0x844   : > { %s2722_s19 = sld [smem:[#allocation27_spill]] }
 0x849   : > { %s1340_s21 = sand.u32 1, %s2721_s2  }
 0x84a   : > { %p2723_p13 = scmp.ne.s32.totalorder %s2722_s19, 0  ;;  %s1341_s18 = scalar_lea.sflag [#allocation6], %s1340_s21 }
 0x84c   : > { %p1691_p1 = pnand %p1695_p12, %p2723_p13 }
 0x84e   : > { %p1692_p3 = pneg %p1691_p1 }
 0x850   : > { %2062 = dma.done.wait (%p1692_p3), %s1341_s18, 128  }
 0x851   : > { %2064 = vsyncadd (%p1692_p3), %s1341_s18, 4294967168  ;;  %s36_s23 = sadd.s32 1, %s2107_s23   ;;  %s2724_s25 = sld [smem:[#allocation19_spill]] }
 0x852   : > { %p33_p6 = scmp.ge.s32.totalorder %s36_s23, 6   ;;  %s2725_s15 = sld [smem:[#allocation31_spill]] }
 0x853   : > { %s2726_s28 = sld [smem:[#allocation21_spill]]  ;;  %s2732_s29 = smov %s2071_s30 }
 0x854   : > { %s2727_s18 = sld [smem:[#allocation32_spill]]  ;;  %s2734_s16 = smov %s2083_s17 }
 0x855   : > { %s2728_s19 = sld [smem:[#allocation24_spill]]  ;;  %35 = sbr.rel (!%p33_p6) target bundleno = 29 (0x1d), region = 204 }
 0x856   : > { %s2729_s20 = sld [smem:[#allocation25_spill]] }
 0x857   : > { %s2730_s21 = sld [smem:[#allocation28_spill]]  ;;  %s2733_s30 = smov %s2724_s25 }
 0x858   : > { %s2731_s22 = sld [smem:[#allocation30_spill]] }
 0x859   : > { %s2735_s17 = smov %s2726_s28 }
 0x85a   :  { %1347 = vsyncpa [#allocation5], 1 }
 0x85b   :  { %1349 = vsyncpa [#allocation5 + $0x1], 1 }
 0x85c   :  { %1350 = vsyncpa [#allocation8], 1 }
 0x85d   :  { %1352 = vsyncpa [#allocation8 + $0x1], 1 }
 0x85e   :  { %1353 = vsyncpa [#allocation11], 1 }
 0x85f   :  { %1355 = vsyncpa [#allocation11 + $0x1], 1 }
 0x860   :  { %1356 = vsyncpa [#allocation6], 1 }
 0x861   :  { %1358 = vsyncpa [#allocation6 + $0x1], 1 }

</bundles_post_ra>
